<compile_context>
chip_gen: v6e
topology: v6e:2x2x1
jax: 0.10.0
libtpu: 0.0.40
codegen_flags: <defaults>
</compile_context>

<pallas_src>
import jax
import jax.numpy as jnp
from jax.experimental import pallas as pl
from jax.experimental.pallas import tpu as pltpu

IMAGE_H = 28
IMAGE_W = 28
IN_DIM = IMAGE_H * IMAGE_W          # 784 = 6*128 + 16 (fringe handled by Mosaic)
HID_DIM = 128
OUT_DIM = 10
MAX_BATCH_TILE = 1024               # HBM-roofline sweet spot from the tile sweep


def _mnet_kernel(x_ref, w1_ref, b1_ref, w2_ref, b2_ref, o_ref):
    # x_ref:  (BT, 784) f32      w1_ref: (784, 128) bf16   b1_ref: (1, 128) f32
    # w2_ref: (128, 10) bf16     b2_ref: (1, 10)  f32      o_ref: (BT, 10) f32
    x = x_ref[...].astype(jnp.bfloat16)                # VPU cast, hidden under DMA
    h = jnp.dot(x, w1_ref[...], preferred_element_type=jnp.float32)
    h = jnp.maximum(h + b1_ref[...], 0.0)              # bias + ReLU in f32 (VPU)
    y = jnp.dot(h.astype(jnp.bfloat16), w2_ref[...],
                preferred_element_type=jnp.float32)
    o_ref[...] = y + b2_ref[...]                       # narrow masked store, 40 B/row


def _round_up(n: int, m: int) -> int:
    return -(-n // m) * m


def _pick_batch_tile(B: int) -> int:
    """Batch tile: large enough to amortize the ~0.35us per-step overhead, small
    enough to keep >= 2 grid steps on big batches (v7x megacore) and stay within
    the default scoped VMEM on all generations."""
    if B <= 512:
        # Single (possibly partial) tile. block == B is always legal (full-dim);
        # otherwise round to the 8-row sublane multiple and let the block overhang.
        return B if (B <= 8 or B % 8 == 0) else _round_up(B, 8)
    # >= 2 steps: ceil(B/2) rounded up to 256, capped at the ~1024-row sweet spot.
    half = _round_up(-(-B // 2), 256)
    return min(MAX_BATCH_TILE, half)


def prepare_params(w1, b1, w2, b2):
    """One-time (model-load) param prep; keep OUT of the per-call jitted forward.

    Weights are stored already transposed as (in_features, out_features); matmul
    operands become bf16, biases stay f32 shaped (1, N). No zero padding needed.
    """
    return (w1.astype(jnp.bfloat16),
            b1.reshape(1, HID_DIM).astype(jnp.float32),
            w2.astype(jnp.bfloat16),
            b2.reshape(1, OUT_DIM).astype(jnp.float32))


@jax.jit
def mnet_forward(x, w1_b, b1_r, w2_b, b2_r):
    """x: (B, 784) f32; prepared params from prepare_params(). Returns (B, 10) f32."""
    B = x.shape[0]
    bt = _pick_batch_tile(B)
    grid = (pl.cdiv(B, bt),)

    return pl.pallas_call(
        _mnet_kernel,
        out_shape=jax.ShapeDtypeStruct((B, OUT_DIM), jnp.float32),
        grid_spec=pltpu.PrefetchScalarGridSpec(
            num_scalar_prefetch=0,
            grid=grid,
            in_specs=[
                pl.BlockSpec((bt, IN_DIM), lambda i: (i, 0)),       # x: batch-tiled, f32
                pl.BlockSpec((IN_DIM, HID_DIM), lambda i: (0, 0)),  # W1: VMEM-resident
                pl.BlockSpec((1, HID_DIM), lambda i: (0, 0)),       # b1: resident
                pl.BlockSpec((HID_DIM, OUT_DIM), lambda i: (0, 0)),  # W2: resident
                pl.BlockSpec((1, OUT_DIM), lambda i: (0, 0)),       # b2: resident
            ],
            out_specs=pl.BlockSpec((bt, OUT_DIM), lambda i: (i, 0)),  # narrow logits
        ),
        compiler_params=pltpu.CompilerParams(
            dimension_semantics=("parallel",),
        ),
    )(x, w1_b, b1_r, w2_b, b2_r)


def init_params(key):
    """Deterministic init matching nn.Linear's U(-1/sqrt(fan_in), 1/sqrt(fan_in)).

    Weights are stored already transposed as (in_features, out_features).
    """
    k1, k2, k3, k4 = jax.random.split(key, 4)
    bound1 = 1.0 / jnp.sqrt(jnp.float32(IN_DIM))
    bound2 = 1.0 / jnp.sqrt(jnp.float32(HID_DIM))
    w1 = jax.random.uniform(k1, (IN_DIM, HID_DIM), jnp.float32, -bound1, bound1)
    b1 = jax.random.uniform(k2, (HID_DIM,), jnp.float32, -bound1, bound1)
    w2 = jax.random.uniform(k3, (HID_DIM, OUT_DIM), jnp.float32, -bound2, bound2)
    b2 = jax.random.uniform(k4, (OUT_DIM,), jnp.float32, -bound2, bound2)
    return w1, b1, w2, b2


def _ref_bf16(x, w1, b1, w2, b2):
    """Reference with the kernel's numerics (bf16 matmul operands, f32 accum)."""
    h = jnp.dot(x.astype(jnp.bfloat16), w1.astype(jnp.bfloat16),
                preferred_element_type=jnp.float32) + b1[None, :]
    h = jnp.maximum(h, 0.0)
    return jnp.dot(h.astype(jnp.bfloat16), w2.astype(jnp.bfloat16),
                   preferred_element_type=jnp.float32) + b2[None, :]


if __name__ == "__main__":
    key = jax.random.PRNGKey(0)
    kx, kx2, kp = jax.random.split(key, 3)

    w1, b1, w2, b2 = init_params(kp)
    params = prepare_params(w1, b1, w2, b2)

    # Small demo batch (B=2): single full-dim block, no padding anywhere.
    B = 2
    x = jax.random.normal(kx, (B, IN_DIM), jnp.float32)
    out = jax.block_until_ready(mnet_forward(x, *params))
    assert out.shape == (B, OUT_DIM)
    assert jnp.allclose(out, _ref_bf16(x, w1, b1, w2, b2), atol=1e-2, rtol=1e-2)
    # Sanity vs. full-f32 math (loose: bf16 operand rounding).
    ref_f32 = jnp.maximum(x @ w1 + b1[None, :], 0.0) @ w2 + b2[None, :]
    assert jnp.allclose(out, ref_f32, atol=5e-2, rtol=5e-2)

    # Uneven batch (B=30 -> 32-row tile with overhang): checks the masked last
    # block and the K=784 contraction fringe against the reference on hardware.
    B2 = 30
    x2 = jax.random.normal(kx2, (B2, IN_DIM), jnp.float32)
    out2 = jax.block_until_ready(mnet_forward(x2, *params))
    assert out2.shape == (B2, OUT_DIM)
    assert jnp.allclose(out2, _ref_bf16(x2, w1, b1, w2, b2), atol=1e-2, rtol=1e-2)

    print("KERNEL_OK")
</pallas_src>

<mosaic_0001>
module attributes {stable_mosaic.version = 11 : i64} {
  func.func @_mnet_kernel(%arg0: i32, %arg1: memref<2x784xf32, #tpu.memory_space<vmem>>, %arg2: memref<784x128xbf16, #tpu.memory_space<vmem>>, %arg3: memref<1x128xf32, #tpu.memory_space<vmem>>, %arg4: memref<128x10xbf16, #tpu.memory_space<vmem>>, %arg5: memref<1x10xf32, #tpu.memory_space<vmem>>, %arg6: memref<2x10xf32, #tpu.memory_space<vmem>>) attributes {dimension_semantics = [#tpu.dimension_semantics<parallel>], iteration_bounds = array<i64: 1>, scalar_prefetch = 0 : i64, scratch_operands = 0 : i64, tpu.core_type = #tpu.core_type<tc>, window_params = [{transform_indices = @transform_0, window_bounds = array<i64: 2, 784>}, {pipeline_mode = #tpu.pipeline_mode<synchronous>, transform_indices = @transform_1, window_bounds = array<i64: 784, 128>}, {pipeline_mode = #tpu.pipeline_mode<synchronous>, transform_indices = @transform_2, window_bounds = array<i64: 1, 128>}, {pipeline_mode = #tpu.pipeline_mode<synchronous>, transform_indices = @transform_3, window_bounds = array<i64: 128, 10>}, {pipeline_mode = #tpu.pipeline_mode<synchronous>, transform_indices = @transform_4, window_bounds = array<i64: 1, 10>}, {transform_indices = @transform_5, window_bounds = array<i64: 2, 10>}]} {
    %c0 = arith.constant 0 : index
    %c0_0 = arith.constant 0 : index
    %0 = vector.load %arg1[%c0, %c0_0] : memref<2x784xf32, #tpu.memory_space<vmem>>, vector<2x784xf32>
    %1 = arith.truncf %0 : vector<2x784xf32> to vector<2x784xbf16>
    %c0_1 = arith.constant 0 : index
    %c0_2 = arith.constant 0 : index
    %2 = vector.load %arg2[%c0_1, %c0_2] : memref<784x128xbf16, #tpu.memory_space<vmem>>, vector<784x128xbf16>
    %cst = arith.constant dense<0.000000e+00> : vector<2x128xf32>
    %3 = tpu.matmul %1, %2, %cst {dimension_numbers = #tpu.dot_dimension_numbers<[1], [0], [0], [1], [0, 0, 1, 1], [], []>} : vector<2x784xbf16>, vector<784x128xbf16>, vector<2x128xf32> -> vector<2x128xf32>
    %c0_3 = arith.constant 0 : index
    %c0_4 = arith.constant 0 : index
    %4 = vector.load %arg3[%c0_3, %c0_4] : memref<1x128xf32, #tpu.memory_space<vmem>>, vector<1x128xf32>
    %5 = vector.broadcast %4 : vector<1x128xf32> to vector<2x128xf32>
    %6 = arith.addf %3, %5 : vector<2x128xf32>
    %cst_5 = arith.constant 0.000000e+00 : f32
    %7 = vector.broadcast %cst_5 : f32 to vector<2x128xf32>
    %8 = arith.maximumf %6, %7 : vector<2x128xf32>
    %9 = arith.truncf %8 : vector<2x128xf32> to vector<2x128xbf16>
    %c0_6 = arith.constant 0 : index
    %c0_7 = arith.constant 0 : index
    %10 = vector.load %arg4[%c0_6, %c0_7] : memref<128x10xbf16, #tpu.memory_space<vmem>>, vector<128x10xbf16>
    %cst_8 = arith.constant dense<0.000000e+00> : vector<2x10xf32>
    %11 = tpu.matmul %9, %10, %cst_8 {dimension_numbers = #tpu.dot_dimension_numbers<[1], [0], [0], [1], [0, 0, 1, 1], [], []>} : vector<2x128xbf16>, vector<128x10xbf16>, vector<2x10xf32> -> vector<2x10xf32>
    %c0_9 = arith.constant 0 : index
    %c0_10 = arith.constant 0 : index
    %12 = vector.load %arg5[%c0_9, %c0_10] : memref<1x10xf32, #tpu.memory_space<vmem>>, vector<1x10xf32>
    %13 = vector.broadcast %12 : vector<1x10xf32> to vector<2x10xf32>
    %14 = arith.addf %11, %13 : vector<2x10xf32>
    %c0_11 = arith.constant 0 : index
    %c0_12 = arith.constant 0 : index
    %15 = vector.load %arg6[%c0_11, %c0_12] : memref<2x10xf32, #tpu.memory_space<vmem>>, vector<2x10xf32>
    tpu.vector_store %arg6[%c0_11, %c0_12], %14 {strides = array<i32>} : memref<2x10xf32, #tpu.memory_space<vmem>>, vector<2x10xf32>,
    return
  }
  func.func @transform_0(%arg0: i32) -> (i32, i32) {
    %c0_i32 = arith.constant 0 : i32
    %c0_i32_0 = arith.constant 0 : i32
    return %arg0, %c0_i32 : i32, i32
  }
  func.func @transform_1(%arg0: i32) -> (i32, i32) {
    %c0_i32 = arith.constant 0 : i32
    %c0_i32_0 = arith.constant 0 : i32
    %c0_i32_1 = arith.constant 0 : i32
    return %c0_i32, %c0_i32_0 : i32, i32
  }
  func.func @transform_2(%arg0: i32) -> (i32, i32) {
    %c0_i32 = arith.constant 0 : i32
    %c0_i32_0 = arith.constant 0 : i32
    %c0_i32_1 = arith.constant 0 : i32
    return %c0_i32, %c0_i32_0 : i32, i32
  }
  func.func @transform_3(%arg0: i32) -> (i32, i32) {
    %c0_i32 = arith.constant 0 : i32
    %c0_i32_0 = arith.constant 0 : i32
    %c0_i32_1 = arith.constant 0 : i32
    return %c0_i32, %c0_i32_0 : i32, i32
  }
  func.func @transform_4(%arg0: i32) -> (i32, i32) {
    %c0_i32 = arith.constant 0 : i32
    %c0_i32_0 = arith.constant 0 : i32
    %c0_i32_1 = arith.constant 0 : i32
    return %c0_i32, %c0_i32_0 : i32, i32
  }
  func.func @transform_5(%arg0: i32) -> (i32, i32) {
    %c0_i32 = arith.constant 0 : i32
    %c0_i32_0 = arith.constant 0 : i32
    return %arg0, %c0_i32 : i32, i32
  }
}

</mosaic_0001>

<bundles_post_ra>
// kernel: mnet_forward.1
= control target key start
LH: loop header
LB: loop body
LE: loop exit
PB: predicated region body
PF: predicated region fallthrough
CT: control target
= control target key end

     0   :  { %10 = vsyncpa [#allocation3], 0  ;;  %s1146_s0 = inlined_call_operand.vmem [shape: f32[2,784], index: 0, kind: input, shape index: {}]   ;;  %s1147_s1 = inlined_call_operand.hbm [shape: bf16[784,128], index: 1, kind: input, shape index: {}]   ;;  %s1148_s2 = inlined_call_operand.vmem [shape: f32[1,128], index: 2, kind: input, shape index: {}]   ;;  %s1149_s3 = inlined_call_operand.vmem [shape: bf16[128,10], index: 3, kind: input, shape index: {}]   ;;  %s1150_s4 = inlined_call_operand.vmem [shape: f32[1,10], index: 4, kind: input, shape index: {}]   ;;  %s1151_s5 = inlined_call_operand.hbm [shape: f32[2,10], index: 5, kind: output, shape index: {}]  }
   0x1   :  { %11 = vsyncpa [#allocation4], 0  ;;  %s1053_s18 = smov [#allocation2]  }
   0x2   :  { %s19_s19 = sshll.u32 %s1053_s18, 4  ;;  %s20_s19 = int_to_ptr.vmem [resolvable:$true] %s19_s19 }
   0x3   :  { %s1017_s20 = scalar_lea.vmem %s20_s19, 6272  ;;  %p1022_p1 = scmp.lt.s32.totalorder %s20_s19, %s20_s19 }
   0x4   :  { %p1018_p0 = scmp.ne.s32.totalorder %s20_s19, %s1017_s20  ;;  %p1023_p2 = scmp.lt.s32.totalorder %s1017_s20, %s1017_s20 }
   0x6   :  { %p1024_p3 = por %p1023_p2, %p1022_p1 }
   0x8   :  { %p1025_p4 = pnand %p1024_p3, %p1018_p0 }
   0xa   :  { %1028 = shalt.err (!%p1025_p4)
}
   0xb   :  { %s1054_s21 = smov 64   ;;  %s1055_s22 = smov 4  }
   0xc   :  { %25 = dma.hbm_to_vmem [thread:$0]  %s1147_s1, 6272, %s20_s19, [#allocation3], %s1054_s21, %s1054_s21, %s1055_s22  }
   0xd   :  { %1049 = dma.done.wait [#allocation3], 6272  }
   0xe   :  { %1050 = vsyncadd [#allocation3], 4294961024  ;;  %v950_v0 = vld [vmem:[#allocation2 + $0x78] sm:$0xff]   ;;  %v954_v4 = vld [vmem:[#allocation2 + $0x70] sm:$0xff]   ;;  %v1056_v21 = vmov 1983009808   ;;  %v44_v23 = vlaneseq }
   0xf   :  { %v951_v1 = vld [vmem:[#allocation2 + $0x38] sm:$0xff]   ;;  %840 = vmatprep.subr.bf16.mxu0 %v950_v0  ;;  %v955_v5 = vld [vmem:[#allocation2 + $0x30] sm:$0xff]   ;;  %v958_v8 = vld [vmem:[#allocation2 + $0x68] sm:$0xff]   ;;  %v42_v22 = vunpack.c.l.s4 %v1056_v21  ;;  %v1057_v45 = vmov 0.0   ;;  %vm1058_vm0 = vmmov 0   ;;  %vm486_vm1 = vcmask 130048  }
  0x10   :  { %v952_v2 = vld [vmem:[#allocation2 + $0xf8] sm:$0xff]   ;;  %841 = vmatpush3.bf16.msra.mxu0 %v951_v1  ;;  %v956_v6 = vld [vmem:[#allocation2 + $0xf0] sm:$0xff]   ;;  %v959_v9 = vld [vmem:[#allocation2 + $0x28] sm:$0xff]   ;;  %v45_v29 = vshrl.u32 %v44_v23, 7  ;;  %s1059_s21 = smov [#allocation5]   ;;  %vm763_vm2 = vcmask 74752  }
  0x11   :  { %v953_v3 = vld [vmem:[#allocation2 + $0xb8] sm:$0xff]   ;;  %862 = vmatprep.subr.bf16.mxu1 %v952_v2  ;;  %842 = vmatprep.subr.bf16.mxu0 %v954_v4  ;;  %v957_v7 = vld [vmem:[#allocation2 + $0xb0] sm:$0xff]   ;;  %v960_v10 = vld [vmem:[#allocation2 + $0xe8] sm:$0xff]   ;;  %v43_v28 = vunpack.c.0.s8 %v42_v22  ;;  %s771_s22 = sshll.u32 %s1059_s21, 4  ;;  %s772_s22 = int_to_ptr.vmem [resolvable:$true] %s771_s22 }
  0x12   :  { %863 = vmatpush3.bf16.msra.mxu1 %v953_v3  ;;  %v961_v11 = vld [vmem:[#allocation2 + $0xa8] sm:$0xff]   ;;  %v962_v12 = vld [vmem:[#allocation2 + $0x60] sm:$0xff]   ;;  %v966_v16 = vld [vmem:[#allocation2 + $0x58] sm:$0xff]   ;;  %p1034_p6 = scmp.lt.s32.totalorder %s772_s22, %s772_s22 }
  0x13   :  { %864 = vmatprep.subr.bf16.mxu1 %v956_v6  ;;  %v963_v13 = vld [vmem:[#allocation2 + $0x20] sm:$0xff]   ;;  %v967_v17 = vld [vmem:[#allocation2 + $0x18] sm:$0xff]   ;;  %v970_v20 = vld [vmem:[#allocation2 + $0x50] sm:$0xff]   ;;  %v46_v34 = vsub.s32 %v43_v28, %v45_v29 }
  0x14   :  { %843 = vmatpush3.bf16.msra.mxu0 %v955_v5  ;;  %v964_v14 = vld [vmem:[#allocation2 + $0xe0] sm:$0xff]   ;;  %v968_v18 = vld [vmem:[#allocation2 + $0xd8] sm:$0xff]   ;;  %v971_v24 = vld [vmem:[#allocation2 + $0x10] sm:$0xff]  }
  0x15   :  { %844 = vmatprep.subr.bf16.mxu0 %v958_v8  ;;  %v965_v15 = vld [vmem:[#allocation2 + $0xa0] sm:$0xff]   ;;  %v969_v19 = vld [vmem:[#allocation2 + $0x98] sm:$0xff]   ;;  %v972_v25 = vld [vmem:[#allocation2 + $0xd0] sm:$0xff]  }
  0x16   :  { %865 = vmatpush3.bf16.msra.mxu1 %v957_v7  ;;  %v973_v26 = vld [vmem:[#allocation2 + $0x90] sm:$0xff]   ;;  %v974_v27 = vld [vmem:[#allocation2 + $0x48] sm:$0xff]   ;;  %v978_v33 = vld [vmem:[#allocation2 + $0x40] sm:$0xff]  }
  0x17   :  { %866 = vmatprep.subr.bf16.mxu1 %v960_v10  ;;  %v975_v30 = vld [vmem:[#allocation2 + $0x8] sm:$0xff]   ;;  %v979_v35 = vld [vmem:[#allocation2] sm:$0xff]   ;;  %v982_v41 = vld [vmem:[#allocation2 + $0x178] sm:$0xff]  }
  0x18   :  { %845 = vmatpush3.bf16.msra.mxu0 %v959_v9  ;;  %v976_v31 = vld [vmem:[#allocation2 + $0xc8] sm:$0xff]   ;;  %v980_v36 = vld [vmem:[#allocation2 + $0xc0] sm:$0xff]   ;;  %v984_v48 = vld [vmem:[#allocation2 + $0x138] sm:$0xff]  }
  0x19   :  { %846 = vmatprep.subr.bf16.mxu0 %v962_v12  ;;  %v977_v32 = vld [vmem:[#allocation2 + $0x88] sm:$0xff]   ;;  %v36_v37 = vld [vmem:[%s1146_s0] sm:$0xff]  ;;  %v985_v50 = vld [vmem:[#allocation2 + $0x170] sm:$0xff]  }
  0x1a   :  { %867 = vmatpush3.bf16.msra.mxu1 %v961_v11  ;;  %v47_v38 = vrot.slane %v36_v37, %v46_v34  ;;  %v981_v39 = vld [vmem:[#allocation2 + $0x80] sm:$0xff]   ;;  %v40_v40 = vcombine.high %v36_v37, %v36_v37  ;;  %v986_v52 = vld [vmem:[#allocation2 + $0x130] sm:$0xff]   ;;  %v987_v53 = vld [vmem:[#allocation2 + $0x168] sm:$0xff]  }
  0x1b   :  { %868 = vmatprep.subr.bf16.mxu1 %v964_v14  ;;  %v988_v54 = vld [vmem:[#allocation2 + $0x128] sm:$0xff]   ;;  %v989_v55 = vld [vmem:[#allocation2 + $0x160] sm:$0xff]   ;;  %v991_v57 = vld [vmem:[#allocation2 + $0x158] sm:$0xff]  }
  0x1c   :  { %847 = vmatpush3.bf16.msra.mxu0 %v963_v13  ;;  %v55_v42 = vcombine.high %v47_v38, %v47_v38  ;;  %v54_v43 = vrot.slane %v40_v40, %v46_v34  ;;  %v80_v44 = vpack.c.bf16 %v47_v38, %v47_v38  ;;  %v990_v56 = vld [vmem:[#allocation2 + $0x120] sm:$0xff]   ;;  %v37_v59 = vld [vmem:[%s1146_s0 + $0x8] sm:$0x3f]  ;;  %v992_v60 = vld [vmem:[#allocation2 + $0x118] sm:$0xff]  }
  0x1d   :  { %848 = vmatprep.subr.bf16.mxu0 %v966_v16  ;;  %v999_v58 = vld [vmem:[#allocation2 + $0x180] sm:$0xff]   ;;  %v57_v61 = vcombine.high %v37_v59, %v37_v59  ;;  %v64_v62 = vrot.slane %v37_v59, %v46_v34  ;;  %v993_v63 = vld [vmem:[#allocation2 + $0x150] sm:$0xff]   ;;  %v995_v5 = vld [vmem:[#allocation2 + $0x148] sm:$0xff]  }
  0x1e   :  { %869 = vmatpush3.bf16.msra.mxu1 %v965_v15  ;;  %v81_v46 = vpack.c.bf16 %v55_v42, %v55_v42  ;;  %v56_v47 = vcombine.high %v54_v43, %v54_v43  ;;  %v82_v49 = vpack.c.bf16 %v54_v43, %v54_v43  ;;  %v994_v4 = vld [vmem:[#allocation2 + $0x110] sm:$0xff]   ;;  %v996_v6 = vld [vmem:[#allocation2 + $0x108] sm:$0xff]   ;;  %v997_v7 = vld [vmem:[#allocation2 + $0x140] sm:$0xff]  }
  0x1f   :  { %870 = vmatprep.subr.bf16.mxu1 %v968_v18  ;;  %v71_v0 = vrot.slane %v57_v61, %v46_v34  ;;  %v72_v1 = vcombine.high %v64_v62, %v64_v62  ;;  %v998_v8 = vld [vmem:[#allocation2 + $0x100] sm:$0xff]   ;;  %v84_v9 = vpack.c.bf16 %v64_v62, %v64_v62  ;;  %v1001_v10 = vld [vmem:[%s1149_s3 + $0x38] sm:$0xff]   ;;  %v1002_v11 = vld [vmem:[%s1149_s3 + $0x30] sm:$0xff]  }
  0x20   :  { %849 = vmatpush3.bf16.msra.mxu0 %v967_v17  ;;  %522 = vmatprep.mubr.bf16.mxu0 %v81_v46  ;;  %v83_v51 = vpack.c.bf16 %v56_v47, %v56_v47  ;;  %v1003_v12 = vld [vmem:[%s1149_s3 + $0x28] sm:$0xff]   ;;  %v1004_v13 = vld [vmem:[%s1149_s3 + $0x20] sm:$0xff]   ;;  %v1005_v14 = vld [vmem:[%s1149_s3 + $0x18] sm:$0xff]  }
  0x21   :  { %850 = vmatprep.subr.bf16.mxu0 %v970_v20  ;;  %v85_v2 = vpack.c.bf16 %v72_v1, %v72_v1  ;;  %v86_v3 = vpack.c.bf16 %v71_v0, %v71_v0  ;;  %v1006_v15 = vld [vmem:[%s1149_s3 + $0x10] sm:$0xff]   ;;  %v1007_v16 = vld [vmem:[%s1149_s3 + $0x8] sm:$0xff]   ;;  %v1008_v17 = vld [vmem:[%s1149_s3] sm:$0xff]  }
  0x22   :  { %871 = vmatpush3.bf16.msra.mxu1 %v969_v19  ;;  %562 = vmatprep.mubr.bf16.mxu1 %v83_v51 }
  0x23   :  { %872 = vmatprep.subr.bf16.mxu1 %v972_v25 }
  0x24   :  { %851 = vmatpush3.bf16.msra.mxu0 %v971_v24 }
  0x25   :  { %852 = vmatprep.subr.bf16.mxu0 %v974_v27 }
  0x26   :  { %873 = vmatpush3.bf16.msra.mxu1 %v973_v26 }
  0x27   :  { %874 = vmatprep.subr.bf16.mxu1 %v976_v31  ;;  %v780_v31 = vld [vmem:[%s1148_s2] ss:$0 sm:$0xff]  ;;  %s1029_s2 = scalar_lea.vmem %s772_s22, 32 }
  0x28   :  { %853 = vmatpush3.bf16.msra.mxu0 %v975_v30  ;;  %p1030_p5 = scmp.ne.s32.totalorder %s772_s22, %s1029_s2  ;;  %p1035_p7 = scmp.lt.s32.totalorder %s1029_s2, %s1029_s2 }
  0x29   :  { %854 = vmatprep.subr.bf16.mxu0 %v978_v33 }
  0x2a   :  { %875 = vmatpush3.bf16.msra.mxu1 %v977_v32  ;;  %p1036_p8 = por %p1035_p7, %p1034_p6 }
  0x2b   :  { %876 = vmatprep.subr.bf16.mxu1 %v980_v36 }
  0x2c   :  { %855 = vmatpush3.bf16.msra.mxu0 %v979_v35  ;;  %p1037_p9 = pnand %p1036_p8, %p1030_p5 }
  0x2d   :  { %884 = vmatprep.subr.bf16.mxu0 %v982_v41 }
  0x2e   :  { %877 = vmatpush3.bf16.msra.mxu1 %v981_v39 }
  0x2f   :  { %917 = vmatprep.subr.bf16.mxu1 %v1057_v45  ;;  %523 = vmatmul.mubr.bf16.vlgmr.msra.gmra.mxu0 %v80_v44  ;;  %v831_v44 = vld [vmem:[%s1150_s4] ss:$0 sm:$0xff] }
  0x30   :  { %885 = vmatpush3.bf16.msra.mxu0 %v984_v48  ;;  %602 = vmatprep.mubr.bf16.mxu0 %v85_v2 }
  0x31   :  { %563 = vmatmul.mubr.bf16.vlgmr.msra.gmra.mxu1 %v82_v49  ;;  %886 = vmatprep.subr.bf16.mxu0 %v985_v50 }
  0x32   :  { %919 = vmatprep.mubr.msk.bf16.mxu1 %vm1058_vm0, %v1057_v45  ;;  %918 = vmatpush3.bf16.msra.mxu1 %v999_v58 }
  0x33   :  { %923 = vmatprep.subr.bf16.mxu1 %v1057_v45 }
  0x34   :  { %887 = vmatpush3.bf16.msra.mxu0 %v986_v52 }
  0x35   :  { %888 = vmatprep.subr.bf16.mxu0 %v987_v53 }
  0x38   :  { %889 = vmatpush3.bf16.msra.mxu0 %v988_v54 }
  0x39   :  { %890 = vmatprep.subr.bf16.mxu0 %v989_v55  ;;  %920 = vmatmul.mubr.msk.bf16.vlgmr.msra.gmra.mxu1 %vm486_vm1, %v86_v3 }
  0x3a   :  { %939 = vmatprep.mubr.msk.bf16.mxu1 %vm1058_vm0, %v1057_v45  ;;  %924 = vmatpush3.bf16.msra.mxu1 %v1001_v10 }
  0x3b   :  { %925 = vmatprep.subr.bf16.mxu1 %v1057_v45 }
  0x3c   :  { %891 = vmatpush3.bf16.msra.mxu0 %v990_v56 }
  0x3d   :  { %892 = vmatprep.subr.bf16.mxu0 %v991_v57 }
  0x3e   :  { %926 = vmatpush3.bf16.msra.mxu1 %v1002_v11 }
  0x3f   :  { %927 = vmatprep.subr.bf16.mxu1 %v1057_v45 }
  0x40   :  { %893 = vmatpush3.bf16.msra.mxu0 %v992_v60 }
  0x41   :  { %894 = vmatprep.subr.bf16.mxu0 %v993_v63 }
  0x42   :  { %928 = vmatpush3.bf16.msra.mxu1 %v1003_v12 }
  0x43   :  { %929 = vmatprep.subr.bf16.mxu1 %v1057_v45 }
  0x44   :  { %895 = vmatpush3.bf16.msra.mxu0 %v994_v4 }
  0x45   :  { %896 = vmatprep.subr.bf16.mxu0 %v995_v5 }
  0x46   :  { %930 = vmatpush3.bf16.msra.mxu1 %v1004_v13 }
  0x47   :  { %931 = vmatprep.subr.bf16.mxu1 %v1057_v45 }
  0x48   :  { %897 = vmatpush3.bf16.msra.mxu0 %v996_v6 }
  0x49   :  { %898 = vmatprep.subr.bf16.mxu0 %v997_v7 }
  0x4a   :  { %932 = vmatpush3.bf16.msra.mxu1 %v1005_v14 }
  0x4b   :  { %933 = vmatprep.subr.bf16.mxu1 %v1057_v45 }
  0x4c   :  { %899 = vmatpush3.bf16.msra.mxu0 %v998_v8 }
  0x4e   :  { %934 = vmatpush3.bf16.msra.mxu1 %v1006_v15 }
  0x4f   :  { %603 = vmatmul.mubr.bf16.vlgmr.msra.gmra.mxu0 %v84_v9  ;;  %935 = vmatprep.subr.bf16.mxu1 %v1057_v45 }
  0x52   :  { %936 = vmatpush3.bf16.msra.mxu1 %v1007_v16 }
  0x53   :  { %937 = vmatprep.subr.bf16.mxu1 %v1057_v45 }
  0x56   :  { %938 = vmatpush3.bf16.msra.mxu1 %v1008_v17 }
  0xef   :  { %v856_v18 = vpop.f32.mrf.mxu0 }
  0xf1   :  { %v857_v19 = vpop.f32.mrf.mxu0  ;;  %v878_v20 = vpop.f32.mrf.mxu1 }
  0xf2   :  { %v858_v30 = vadd.f32 %v857_v19, %v856_v18 }
  0xf3   :  { %v859_v21 = vpop.f32.mrf.mxu0  ;;  %v879_v22 = vpop.f32.mrf.mxu1 }
  0xf4   :  { %v525_v32 = vadd.f32 %v858_v30, %v780_v31  ;;  %v880_v33 = vadd.f32 %v879_v22, %v878_v20 }
  0xf5   :  { %v860_v23 = vpop.f32.mrf.mxu0  ;;  %v881_v24 = vpop.f32.mrf.mxu1 }
  0xf6   :  { %v565_v36 = vadd.f32 %v880_v33, %v525_v32 }
  0xf7   :  { %v882_v25 = vpop.f32.mrf.mxu1 }
  0xf9   :  { %v644_v26 = vpop.f32.mrf.mxu1 }
  0xfb   :  { %v921_v27 = vpop.f32.mrf.mxu1 }
  0xfd   :  { %v647_v28 = vpop.f32.mrf.mxu1 }
  0xff   :  { %v922_v29 = vpop.f32.mrf.mxu1 }
 0x10f   :  { %v900_v34 = vpop.f32.mrf.mxu0 }
 0x111   :  { %v901_v35 = vpop.f32.mrf.mxu0 }
 0x112   :  { %v902_v37 = vadd.f32 %v901_v35, %v900_v34 }
 0x113   :  { %v903_v38 = vpop.f32.mrf.mxu0 }
 0x114   :  { %v605_v39 = vadd.f32 %v902_v37, %v565_v36 }
 0x115   :  { %v904_v40 = vpop.f32.mrf.mxu0 }
 0x116   :  { %v645_v41 = vadd.f32 %v644_v26, %v605_v39 }
 0x118   :  { %v650_v42 = vmax.f32 %v645_v41, 0.0 }
 0x11a   :  { %v651_v43 = vpack.c.bf16 %v650_v42, %v650_v42 }
 0x11c   :  { %940 = vmatmul.mubr.bf16.vlgmr.msra.gmra.mxu1 %v651_v43 }
 0x1dc   :  { %v757_v45 = vpop.f32.mrf.mxu1 }
 0x1dd   :  { %v758_v46 = vadd.f32 %v831_v44, %v757_v45 }
 0x1de   :  { %v941_v47 = vpop.f32.mrf.mxu1 }
 0x1df   :  { %764 = vst.msk [vmem:[#allocation5] sm:$0x3] %vm763_vm2, %v758_v46 }
 0x1e0   :  { %v760_v48 = vpop.f32.mrf.mxu1 }
 0x1e1   :  { %1040 = shalt.err (!%p1037_p9)
}
 0x1e2   :  { %774 = dma.vmem_to_hbm [thread:$0]  %s772_s22, 32, %s1151_s5, [#allocation4]   ;;  %v942_v49 = vpop.f32.mrf.mxu1 }
 0x1e3   :  { %1051 = dma.done.wait [#allocation4], 32  }
 0x1e4   :  { %1052 = vsyncadd [#allocation4], 4294967264 }
 0x1e5   :  { %778 = vsyncpa [#allocation3], 1 }
 0x1e6   :  { %779 = vsyncpa [#allocation4], 1 }

</bundles_post_ra>
